<compile_context>
chip_gen: v5e
topology: v5e:2x2
jax: 0.10.0
libtpu: 0.0.40
codegen_flags: <defaults>
</compile_context>

<pallas_src>
import functools

import jax
import jax.numpy as jnp
from jax.experimental import pallas as pl
from jax.experimental.pallas import tpu as pltpu

_MIB = 1024 * 1024
_FUSED_MAX_MP = 1024  # padded-M threshold for the fully fused single kernel


def _round_up(x: int, m: int) -> int:
    return ((x + m - 1) // m) * m


@functools.lru_cache(maxsize=1)
def _vmem_capacity() -> int:
    try:
        return int(pltpu.get_tpu_info().vmem_capacity_bytes)
    except Exception:
        return 64 * _MIB  # conservative default (v7x per-core VMEM)


def _vmem_limit(footprint_bytes: int, vmem_cap: int) -> int:
    # Footprint + headroom for Mosaic internal scratch, but always leave at
    # least 16 MiB of physical VMEM free (important on v7x's 64 MiB).
    limit = max(footprint_bytes + 16 * _MIB, 32 * _MIB)
    return int(min(limit, vmem_cap - 16 * _MIB))


# ----------------------------------------------------------------------------
# Fused kernel: out[:, :Mp] = x1 @ x2 (accumulated over the K grid),
#               out[:, Mp:] = s1 @ s1   (computed on the last K step).
# ----------------------------------------------------------------------------
def _fused_kernel(x1_ref, x2_ref, o_ref):
    k = pl.program_id(0)
    mp = x1_ref.shape[0]  # static Python int

    @pl.when(k == 0)
    def _init():
        o_ref[...] = jnp.zeros_like(o_ref)

    # Accumulate s1 directly into the (grid-resident) left half of the output.
    partial = jnp.dot(x1_ref[...], x2_ref[...], preferred_element_type=jnp.float32)
    o_ref[:, :mp] = o_ref[:, :mp] + partial

    @pl.when(k == pl.num_programs(0) - 1)
    def _finish():
        s1 = o_ref[:, :mp]
        o_ref[:, mp:] = jnp.dot(s1, s1, preferred_element_type=jnp.float32)


def _fused_forward(x1, x2):
    M, K = x1.shape
    vmem_cap = _vmem_capacity()

    Mp = _round_up(M, 128)
    tk = min(512, _round_up(K, 128))
    Kp = _round_up(K, tk)

    if (Mp, Kp) != (M, K):
        x1 = jnp.pad(x1, ((0, Mp - M), (0, Kp - K)))
    if (Kp, Mp) != x2.shape:
        x2 = jnp.pad(x2, ((0, Kp - x2.shape[0]), (0, Mp - x2.shape[1])))

    nk = Kp // tk
    # double-buffered inputs + (conservatively) double-buffered resident output
    footprint = 4 * (2 * Mp * tk + 2 * tk * Mp + 2 * Mp * 2 * Mp)
    flops = 2 * Mp * Mp * Kp + 2 * Mp * Mp * Mp
    bytes_accessed = 4 * (Mp * Kp + Kp * Mp + Mp * 2 * Mp)

    out = pl.pallas_call(
        _fused_kernel,
        out_shape=jax.ShapeDtypeStruct((Mp, 2 * Mp), jnp.float32),
        grid_spec=pltpu.PrefetchScalarGridSpec(
            num_scalar_prefetch=0,
            grid=(nk,),
            in_specs=[
                pl.BlockSpec((Mp, tk), lambda k: (0, k)),
                pl.BlockSpec((tk, Mp), lambda k: (k, 0)),
            ],
            out_specs=pl.BlockSpec((Mp, 2 * Mp), lambda k: (0, 0)),
        ),
        compiler_params=pltpu.CompilerParams(
            dimension_semantics=("arbitrary",),
            vmem_limit_bytes=_vmem_limit(footprint, vmem_cap),
        ),
        cost_estimate=pl.CostEstimate(
            flops=flops, transcendentals=0, bytes_accessed=bytes_accessed
        ),
    )(x1, x2)

    if Mp == M:
        return out  # no padding: output is already [s1 | s2], no extra passes
    s1 = out[:M, :M]
    s2 = out[:M, Mp:Mp + M]
    return jnp.concatenate([s1, s2], axis=1)


# ----------------------------------------------------------------------------
# Fallback: two tiled-matmul pallas_calls (accumulate directly into o_ref).
# ----------------------------------------------------------------------------
def _mm_kernel(a_ref, b_ref, o_ref):
    @pl.when(pl.program_id(2) == 0)
    def _():
        o_ref[...] = jnp.zeros_like(o_ref)

    o_ref[...] += jnp.dot(a_ref[...], b_ref[...], preferred_element_type=jnp.float32)


def _mm_padded(a, b, *, tm, tn, tk, vmem_cap):
    M, K = a.shape
    _, N = b.shape
    assert M % tm == 0 and N % tn == 0 and K % tk == 0

    grid = (M // tm, N // tn, K // tk)
    footprint = 4 * (2 * tm * tk + 2 * tk * tn + 2 * tm * tn)
    flops = 2 * M * N * K
    bytes_accessed = 4 * (M * K * (N // tn) + K * N * (M // tm) + M * N)

    return pl.pallas_call(
        _mm_kernel,
        out_shape=jax.ShapeDtypeStruct((M, N), jnp.float32),
        grid_spec=pltpu.PrefetchScalarGridSpec(
            num_scalar_prefetch=0,
            grid=grid,
            in_specs=[
                pl.BlockSpec((tm, tk), lambda i, j, k: (i, k)),
                pl.BlockSpec((tk, tn), lambda i, j, k: (k, j)),
            ],
            out_specs=pl.BlockSpec((tm, tn), lambda i, j, k: (i, j)),
        ),
        compiler_params=pltpu.CompilerParams(
            dimension_semantics=("parallel", "parallel", "arbitrary"),
            vmem_limit_bytes=_vmem_limit(footprint, vmem_cap),
        ),
        cost_estimate=pl.CostEstimate(
            flops=flops, transcendentals=0, bytes_accessed=bytes_accessed
        ),
    )(a, b)


def _two_phase_forward(x1, x2, *, tile_mn=None, tile_k=None):
    M, K = x1.shape
    vmem_cap = _vmem_capacity()
    if tile_mn is None:
        tile_mn = 512  # safe on all generations (v7x-friendly footprint)
    if tile_k is None:
        tile_k = 1024 if vmem_cap > 96 * _MIB else 512  # bigger K tiles on v5e/v6e

    Mp = _round_up(M, tile_mn)
    tk1 = min(tile_k, _round_up(K, 128))
    Kp = _round_up(K, tk1)

    if (Mp, Kp) != (M, K):
        x1 = jnp.pad(x1, ((0, Mp - M), (0, Kp - K)))
    if (Kp, Mp) != x2.shape:
        x2 = jnp.pad(x2, ((0, Kp - x2.shape[0]), (0, Mp - x2.shape[1])))

    # Phase 1: s1 (kept padded -- no slice/re-pad between phases).
    s1p = _mm_padded(x1, x2, tm=tile_mn, tn=tile_mn, tk=tk1, vmem_cap=vmem_cap)
    # Phase 2: s2 = s1 @ s1, streaming the padded s1 as both operands.
    tk2 = tile_k if Mp % tile_k == 0 else tile_mn
    s2p = _mm_padded(s1p, s1p, tm=tile_mn, tn=tile_mn, tk=tk2, vmem_cap=vmem_cap)

    if Mp == M:
        return jnp.concatenate([s1p, s2p], axis=1)
    return jnp.concatenate([s1p[:M, :M], s2p[:M, :M]], axis=1)


# ----------------------------------------------------------------------------
# Public forward
# ----------------------------------------------------------------------------
@jax.jit
def model_forward(x1, x2):
    m, k = x1.shape
    k2, n = x2.shape
    assert k == k2, "inner dims of x1 @ x2 must match"
    assert n == m, "s2 = (x1@x2) @ (x1@x2) requires x2 to be (K, M)"

    if _round_up(m, 128) <= _FUSED_MAX_MP:
        return _fused_forward(x1, x2)
    return _two_phase_forward(x1, x2)


def _rel_err(out, ref):
    return float(jnp.max(jnp.abs(out - ref)) / (jnp.max(jnp.abs(ref)) + 1e-6))


if __name__ == "__main__":
    key = jax.random.PRNGKey(0)
    k1, k2, k3, k4 = jax.random.split(key, 4)
    HI = jax.lax.Precision.HIGHEST

    # --- Spec-implied small shapes: x1 (M, K), x2 (K, M) -> out (M, 2M). ---
    M, K = 8, 16
    x1 = jax.random.normal(k1, (M, K), dtype=jnp.float32)
    x2 = jax.random.normal(k2, (K, M), dtype=jnp.float32)

    out = model_forward(x1, x2)
    jax.block_until_ready(out)

    s1 = jnp.dot(x1, x2, precision=HI)
    ref = jnp.concatenate([s1, jnp.dot(s1, s1, precision=HI)], axis=1)
    assert out.shape == (M, 2 * M)
    assert _rel_err(out, ref) < 1e-2, "small-case mismatch"

    # --- Larger case: exercises multi-step K accumulation in the fused kernel. ---
    M2, K2 = 128, 1024
    y1 = jax.random.normal(k3, (M2, K2), dtype=jnp.float32)
    y2 = jax.random.normal(k4, (K2, M2), dtype=jnp.float32)

    out2 = model_forward(y1, y2)
    jax.block_until_ready(out2)

    t1 = jnp.dot(y1, y2, precision=HI)
    ref2 = jnp.concatenate([t1, jnp.dot(t1, t1, precision=HI)], axis=1)
    assert out2.shape == (M2, 2 * M2)
    assert _rel_err(out2, ref2) < 1e-2, "fused multi-K case mismatch"

    # --- Validate the two-phase fallback path (small tiles keep it cheap). ---
    two_phase = jax.jit(
        functools.partial(_two_phase_forward, tile_mn=128, tile_k=256)
    )
    out3 = two_phase(y1, y2)
    jax.block_until_ready(out3)
    assert out3.shape == (M2, 2 * M2)
    assert _rel_err(out3, ref2) < 1e-2, "two-phase fallback mismatch"

    print("KERNEL_OK")
</pallas_src>

<mosaic_0001>
module attributes {stable_mosaic.version = 11 : i64} {
  func.func @_fused_kernel(%arg0: i32, %arg1: memref<128x128xf32, #tpu.memory_space<vmem>>, %arg2: memref<128x128xf32, #tpu.memory_space<vmem>>, %arg3: memref<128x256xf32, #tpu.memory_space<vmem>>) attributes {dimension_semantics = [#tpu.dimension_semantics<arbitrary>], iteration_bounds = array<i64: 1>, scalar_prefetch = 0 : i64, scratch_operands = 0 : i64, tpu.core_type = #tpu.core_type<tc>, window_params = [{transform_indices = @transform_0, window_bounds = array<i64: 128, 128>}, {transform_indices = @transform_1, window_bounds = array<i64: 128, 128>}, {pipeline_mode = #tpu.pipeline_mode<synchronous>, transform_indices = @transform_2, window_bounds = array<i64: 128, 256>}]} {
    %c0_i32 = arith.constant 0 : i32
    %0 = arith.cmpi eq, %arg0, %c0_i32 : i32
    %1 = arith.extui %0 : i1 to i32
    %c0_i32_0 = arith.constant 0 : i32
    %2 = arith.cmpi ne, %1, %c0_i32_0 : i32
    scf.if %2 {
      %cst_10 = arith.constant 0.000000e+00 : f32
      %12 = vector.broadcast %cst_10 : f32 to vector<128x256xf32>
      %c0_11 = arith.constant 0 : index
      %c0_12 = arith.constant 0 : index
      %13 = vector.load %arg3[%c0_11, %c0_12] : memref<128x256xf32, #tpu.memory_space<vmem>>, vector<128x256xf32>
      tpu.vector_store %arg3[%c0_11, %c0_12], %12 {strides = array<i32>} : memref<128x256xf32, #tpu.memory_space<vmem>>, vector<128x256xf32>,
    } else {
    }
    %c0 = arith.constant 0 : index
    %c0_1 = arith.constant 0 : index
    %3 = vector.load %arg1[%c0, %c0_1] : memref<128x128xf32, #tpu.memory_space<vmem>>, vector<128x128xf32>
    %c0_2 = arith.constant 0 : index
    %c0_3 = arith.constant 0 : index
    %4 = vector.load %arg2[%c0_2, %c0_3] : memref<128x128xf32, #tpu.memory_space<vmem>>, vector<128x128xf32>
    %cst = arith.constant dense<0.000000e+00> : vector<128x128xf32>
    %5 = tpu.matmul %3, %4, %cst {dimension_numbers = #tpu.dot_dimension_numbers<[1], [0], [0], [1], [0, 0, 1, 1], [], []>} : vector<128x128xf32>, vector<128x128xf32>, vector<128x128xf32> -> vector<128x128xf32>
    %c0_4 = arith.constant 0 : index
    %c0_5 = arith.constant 0 : index
    %6 = vector.load %arg3[%c0_4, %c0_5] : memref<128x256xf32, #tpu.memory_space<vmem>>, vector<128x128xf32>
    %7 = arith.addf %6, %5 : vector<128x128xf32>
    %c0_6 = arith.constant 0 : index
    %c0_7 = arith.constant 0 : index
    %8 = vector.load %arg3[%c0_6, %c0_7] : memref<128x256xf32, #tpu.memory_space<vmem>>, vector<128x128xf32>
    tpu.vector_store %arg3[%c0_6, %c0_7], %7 {strides = array<i32>} : memref<128x256xf32, #tpu.memory_space<vmem>>, vector<128x128xf32>,
    %c0_i32_8 = arith.constant 0 : i32
    %9 = arith.cmpi eq, %arg0, %c0_i32_8 : i32
    %10 = arith.extui %9 : i1 to i32
    %c0_i32_9 = arith.constant 0 : i32
    %11 = arith.cmpi ne, %10, %c0_i32_9 : i32
    scf.if %11 {
      %c0_10 = arith.constant 0 : index
      %c0_11 = arith.constant 0 : index
      %12 = vector.load %arg3[%c0_10, %c0_11] : memref<128x256xf32, #tpu.memory_space<vmem>>, vector<128x128xf32>
      %cst_12 = arith.constant dense<0.000000e+00> : vector<128x128xf32>
      %13 = tpu.matmul %12, %12, %cst_12 {dimension_numbers = #tpu.dot_dimension_numbers<[1], [0], [0], [1], [0, 0, 1, 1], [], []>} : vector<128x128xf32>, vector<128x128xf32>, vector<128x128xf32> -> vector<128x128xf32>
      %c0_13 = arith.constant 0 : index
      %c128 = arith.constant 128 : index
      %14 = vector.load %arg3[%c0_13, %c128] : memref<128x256xf32, #tpu.memory_space<vmem>>, vector<128x128xf32>
      tpu.vector_store %arg3[%c0_13, %c128], %13 {strides = array<i32>} : memref<128x256xf32, #tpu.memory_space<vmem>>, vector<128x128xf32>,
    } else {
    }
    return
  }
  func.func @transform_0(%arg0: i32) -> (i32, i32) {
    %c0_i32 = arith.constant 0 : i32
    %c0_i32_0 = arith.constant 0 : i32
    return %c0_i32, %arg0 : i32, i32
  }
  func.func @transform_1(%arg0: i32) -> (i32, i32) {
    %c0_i32 = arith.constant 0 : i32
    %c0_i32_0 = arith.constant 0 : i32
    return %arg0, %c0_i32 : i32, i32
  }
  func.func @transform_2(%arg0: i32) -> (i32, i32) {
    %c0_i32 = arith.constant 0 : i32
    %c0_i32_0 = arith.constant 0 : i32
    %c0_i32_1 = arith.constant 0 : i32
    return %c0_i32, %c0_i32_0 : i32, i32
  }
}

</mosaic_0001>

<bundles_post_ra>
// kernel: model_forward.1
= control target key start
LH: loop header
LB: loop body
LE: loop exit
PB: predicated region body
PF: predicated region fallthrough
CT: control target
= control target key end

     0   :  { %s542_s1 = inlined_call_operand.vmem [shape: f32[128,128], index: 1, kind: input, shape index: {}]   ;;  %s543_s0 = inlined_call_operand.vmem [shape: f32[128,128], index: 0, kind: input, shape index: {}]   ;;  %s544_s2 = inlined_call_operand.vmem [shape: f32[128,256], index: 2, kind: output, shape index: {}]  }
   0x1   :  { %v78_v0 = vld [vmem:[%s542_s1 + $0x78] sm:$0xff]  ;;  %v77_v1 = vld [vmem:[%s542_s1 + $0x70] sm:$0xff]  ;;  %v76_v2 = vld [vmem:[%s542_s1 + $0x68] sm:$0xff] }
   0x2   :  { %296 = vmatpush.msra.mxu2 %v78_v0  ;;  %79 = vmatpush.msra.mxu0 %v78_v0  ;;  %v75_v3 = vld [vmem:[%s542_s1 + $0x60] sm:$0xff]  ;;  %v74_v4 = vld [vmem:[%s542_s1 + $0x58] sm:$0xff]  ;;  %v73_v5 = vld [vmem:[%s542_s1 + $0x50] sm:$0xff] }
   0x3   :  { %v72_v6 = vld [vmem:[%s542_s1 + $0x48] sm:$0xff]  ;;  %v71_v7 = vld [vmem:[%s542_s1 + $0x40] sm:$0xff]  ;;  %v70_v8 = vld [vmem:[%s542_s1 + $0x38] sm:$0xff] }
   0x4   :  { %297 = vmatpush.msra.mxu2 %v77_v1  ;;  %80 = vmatpush.msra.mxu0 %v77_v1  ;;  %v69_v9 = vld [vmem:[%s542_s1 + $0x30] sm:$0xff]  ;;  %v68_v10 = vld [vmem:[%s542_s1 + $0x28] sm:$0xff]  ;;  %v67_v11 = vld [vmem:[%s542_s1 + $0x20] sm:$0xff] }
   0x5   :  { %v66_v12 = vld [vmem:[%s542_s1 + $0x18] sm:$0xff]  ;;  %v65_v13 = vld [vmem:[%s542_s1 + $0x10] sm:$0xff]  ;;  %v64_v14 = vld [vmem:[%s542_s1 + $0x8] sm:$0xff] }
   0x6   :  { %298 = vmatpush.msra.mxu2 %v76_v2  ;;  %81 = vmatpush.msra.mxu0 %v76_v2  ;;  %v63_v15 = vld [vmem:[%s542_s1] sm:$0xff]  ;;  %v56_v18 = vld [vmem:[%s543_s0 + $0x48] sm:$0xff]  ;;  %v57_v20 = vld [vmem:[%s543_s0 + $0x50] sm:$0xff] }
   0x7   :  { %v55_v16 = vld [vmem:[%s543_s0 + $0x40] sm:$0xff]  ;;  %v48_v19 = vld [vmem:[%s543_s0 + $0x8] sm:$0xff]  ;;  %v49_v21 = vld [vmem:[%s543_s0 + $0x10] sm:$0xff] }
   0x8   :  { %299 = vmatpush.msra.mxu2 %v75_v3  ;;  %82 = vmatpush.msra.mxu0 %v75_v3  ;;  %v47_v17 = vld [vmem:[%s543_s0] sm:$0xff]  ;;  %v58_v22 = vld [vmem:[%s543_s0 + $0x58] sm:$0xff]  ;;  %v60_v26 = vld [vmem:[%s543_s0 + $0x68] sm:$0xff] }
   0x9   :  { %v50_v23 = vld [vmem:[%s543_s0 + $0x18] sm:$0xff]  ;;  %v59_v24 = vld [vmem:[%s543_s0 + $0x60] sm:$0xff]  ;;  %v52_v27 = vld [vmem:[%s543_s0 + $0x28] sm:$0xff] }
   0xa   :  { %300 = vmatpush.msra.mxu2 %v74_v4  ;;  %83 = vmatpush.msra.mxu0 %v74_v4  ;;  %v51_v25 = vld [vmem:[%s543_s0 + $0x20] sm:$0xff]  ;;  %v61_v28 = vld [vmem:[%s543_s0 + $0x70] sm:$0xff]  ;;  %v62_v30 = vld [vmem:[%s543_s0 + $0x78] sm:$0xff] }
   0xb   :  { %v53_v29 = vld [vmem:[%s543_s0 + $0x30] sm:$0xff]  ;;  %v54_v31 = vld [vmem:[%s543_s0 + $0x38] sm:$0xff] }
   0xc   :  { %301 = vmatpush.msra.mxu2 %v73_v5  ;;  %84 = vmatpush.msra.mxu0 %v73_v5 }
   0xe   :  { %302 = vmatpush.msra.mxu2 %v72_v6  ;;  %85 = vmatpush.msra.mxu0 %v72_v6 }
  0x10   :  { %303 = vmatpush.msra.mxu2 %v71_v7  ;;  %86 = vmatpush.msra.mxu0 %v71_v7 }
  0x12   :  { %304 = vmatpush.msra.mxu2 %v70_v8  ;;  %87 = vmatpush.msra.mxu0 %v70_v8 }
  0x14   :  { %305 = vmatpush.msra.mxu2 %v69_v9  ;;  %88 = vmatpush.msra.mxu0 %v69_v9 }
  0x16   :  { %306 = vmatpush.msra.mxu2 %v68_v10  ;;  %89 = vmatpush.msra.mxu0 %v68_v10 }
  0x18   :  { %307 = vmatpush.msra.mxu2 %v67_v11  ;;  %90 = vmatpush.msra.mxu0 %v67_v11 }
  0x1a   :  { %308 = vmatpush.msra.mxu2 %v66_v12  ;;  %91 = vmatpush.msra.mxu0 %v66_v12 }
  0x1c   :  { %309 = vmatpush.msra.mxu2 %v65_v13  ;;  %92 = vmatpush.msra.mxu0 %v65_v13 }
  0x1e   :  { %310 = vmatpush.msra.mxu2 %v64_v14  ;;  %93 = vmatpush.msra.mxu0 %v64_v14 }
  0x20   :  { %311 = vmatpush.msra.mxu2 %v63_v15  ;;  %94 = vmatpush.msra.mxu0 %v63_v15 }
  0x21   :  { %119 = vmatmul.f32.vlgmr.msra.gmra.mxu2 %v55_v16  ;;  %95 = vmatmul.f32.vlgmr.msra.gmra.mxu0 %v47_v17 }
  0x29   :  { %122 = vmatmul.f32.gmra.mxu2 %v56_v18  ;;  %98 = vmatmul.f32.gmra.mxu0 %v48_v19 }
  0x31   :  { %125 = vmatmul.f32.gmra.mxu2 %v57_v20  ;;  %101 = vmatmul.f32.gmra.mxu0 %v49_v21 }
  0x39   :  { %128 = vmatmul.f32.gmra.mxu2 %v58_v22  ;;  %104 = vmatmul.f32.gmra.mxu0 %v50_v23 }
  0x41   :  { %131 = vmatmul.f32.gmra.mxu2 %v59_v24  ;;  %107 = vmatmul.f32.gmra.mxu0 %v51_v25 }
  0x49   :  { %134 = vmatmul.f32.gmra.mxu2 %v60_v26  ;;  %110 = vmatmul.f32.gmra.mxu0 %v52_v27 }
  0x51   :  { %137 = vmatmul.f32.gmra.mxu2 %v61_v28  ;;  %113 = vmatmul.f32.gmra.mxu0 %v53_v29 }
  0x59   :  { %140 = vmatmul.f32.gmra.mxu2 %v62_v30  ;;  %116 = vmatmul.f32.gmra.mxu0 %v54_v31 }
  0x9e   :  { %v440_v32 = vpop.f32.mrf.mxu0 }
  0x9f   :  { %176 = vst [vmem:[%s544_s2] sm:$0xff] %v440_v32 }
  0xa4   :  { %v120_v33 = vpop.f32.mrf.mxu2 }
  0xa5   :  { %184 = vst [vmem:[%s544_s2 + $0x80] sm:$0xff] %v120_v33 }
  0xa6   :  { %v99_v34 = vpop.f32.mrf.mxu0 }
  0xa7   :  { %177 = vst [vmem:[%s544_s2 + $0x10] sm:$0xff] %v99_v34 }
  0xac   :  { %v123_v35 = vpop.f32.mrf.mxu2 }
  0xad   :  { %185 = vst [vmem:[%s544_s2 + $0x90] sm:$0xff] %v123_v35 }
  0xae   :  { %v102_v36 = vpop.f32.mrf.mxu0 }
  0xaf   :  { %178 = vst [vmem:[%s544_s2 + $0x20] sm:$0xff] %v102_v36 }
  0xb4   :  { %v126_v37 = vpop.f32.mrf.mxu2 }
  0xb5   :  { %186 = vst [vmem:[%s544_s2 + $0xa0] sm:$0xff] %v126_v37 }
  0xb6   :  { %v105_v38 = vpop.f32.mrf.mxu0 }
  0xb7   :  { %179 = vst [vmem:[%s544_s2 + $0x30] sm:$0xff] %v105_v38 }
  0xbc   :  { %v129_v39 = vpop.f32.mrf.mxu2 }
  0xbd   :  { %187 = vst [vmem:[%s544_s2 + $0xb0] sm:$0xff] %v129_v39 }
  0xbe   :  { %v108_v40 = vpop.f32.mrf.mxu0 }
  0xbf   :  { %180 = vst [vmem:[%s544_s2 + $0x40] sm:$0xff] %v108_v40 }
  0xc4   :  { %v132_v41 = vpop.f32.mrf.mxu2 }
  0xc5   :  { %188 = vst [vmem:[%s544_s2 + $0xc0] sm:$0xff] %v132_v41 }
  0xc6   :  { %v111_v42 = vpop.f32.mrf.mxu0 }
  0xc7   :  { %181 = vst [vmem:[%s544_s2 + $0x50] sm:$0xff] %v111_v42 }
  0xcc   :  { %v135_v43 = vpop.f32.mrf.mxu2 }
  0xcd   :  { %189 = vst [vmem:[%s544_s2 + $0xd0] sm:$0xff] %v135_v43 }
  0xce   :  { %v114_v44 = vpop.f32.mrf.mxu0 }
  0xcf   :  { %182 = vst [vmem:[%s544_s2 + $0x60] sm:$0xff] %v114_v44 }
  0xd4   :  { %v138_v45 = vpop.f32.mrf.mxu2 }
  0xd5   :  { %190 = vst [vmem:[%s544_s2 + $0xe0] sm:$0xff] %v138_v45 }
  0xd6   :  { %v117_v46 = vpop.f32.mrf.mxu0 }
  0xd7   :  { %183 = vst [vmem:[%s544_s2 + $0x70] sm:$0xff] %v117_v46 }
  0xdc   :  { %v141_v47 = vpop.f32.mrf.mxu2 }
  0xdd   :  { %191 = vst [vmem:[%s544_s2 + $0xf0] sm:$0xff] %v141_v47  ;;  %211 = vmatpush.msra.mxu1 %v141_v47  ;;  %312 = vmatpush.msra.mxu3 %v141_v47 }
  0xdf   :  { %212 = vmatpush.msra.mxu1 %v138_v45  ;;  %313 = vmatpush.msra.mxu3 %v138_v45 }
  0xe1   :  { %213 = vmatpush.msra.mxu1 %v135_v43  ;;  %314 = vmatpush.msra.mxu3 %v135_v43 }
  0xe3   :  { %214 = vmatpush.msra.mxu1 %v132_v41  ;;  %315 = vmatpush.msra.mxu3 %v132_v41 }
  0xe5   :  { %215 = vmatpush.msra.mxu1 %v129_v39  ;;  %316 = vmatpush.msra.mxu3 %v129_v39 }
  0xe7   :  { %216 = vmatpush.msra.mxu1 %v126_v37  ;;  %317 = vmatpush.msra.mxu3 %v126_v37 }
  0xe9   :  { %217 = vmatpush.msra.mxu1 %v123_v35  ;;  %318 = vmatpush.msra.mxu3 %v123_v35 }
  0xeb   :  { %218 = vmatpush.msra.mxu1 %v120_v33  ;;  %319 = vmatpush.msra.mxu3 %v120_v33 }
  0xed   :  { %219 = vmatpush.msra.mxu1 %v117_v46  ;;  %320 = vmatpush.msra.mxu3 %v117_v46 }
  0xef   :  { %220 = vmatpush.msra.mxu1 %v114_v44  ;;  %321 = vmatpush.msra.mxu3 %v114_v44 }
  0xf1   :  { %221 = vmatpush.msra.mxu1 %v111_v42  ;;  %322 = vmatpush.msra.mxu3 %v111_v42 }
  0xf3   :  { %222 = vmatpush.msra.mxu1 %v108_v40  ;;  %323 = vmatpush.msra.mxu3 %v108_v40 }
  0xf5   :  { %223 = vmatpush.msra.mxu1 %v105_v38  ;;  %324 = vmatpush.msra.mxu3 %v105_v38 }
  0xf7   :  { %224 = vmatpush.msra.mxu1 %v102_v36  ;;  %325 = vmatpush.msra.mxu3 %v102_v36 }
  0xf9   :  { %225 = vmatpush.msra.mxu1 %v99_v34  ;;  %326 = vmatpush.msra.mxu3 %v99_v34 }
  0xfb   :  { %226 = vmatpush.msra.mxu1 %v440_v32  ;;  %327 = vmatpush.msra.mxu3 %v440_v32 }
  0xfc   :  { %227 = vmatmul.f32.vlgmr.msra.gmra.mxu1 %v440_v32  ;;  %251 = vmatmul.f32.vlgmr.msra.gmra.mxu3 %v120_v33 }
 0x104   :  { %230 = vmatmul.f32.gmra.mxu1 %v99_v34  ;;  %254 = vmatmul.f32.gmra.mxu3 %v123_v35 }
 0x10c   :  { %233 = vmatmul.f32.gmra.mxu1 %v102_v36  ;;  %257 = vmatmul.f32.gmra.mxu3 %v126_v37 }
 0x114   :  { %236 = vmatmul.f32.gmra.mxu1 %v105_v38  ;;  %260 = vmatmul.f32.gmra.mxu3 %v129_v39 }
 0x11c   :  { %239 = vmatmul.f32.gmra.mxu1 %v108_v40  ;;  %263 = vmatmul.f32.gmra.mxu3 %v132_v41 }
 0x124   :  { %242 = vmatmul.f32.gmra.mxu1 %v111_v42  ;;  %266 = vmatmul.f32.gmra.mxu3 %v135_v43 }
 0x12c   :  { %245 = vmatmul.f32.gmra.mxu1 %v114_v44  ;;  %269 = vmatmul.f32.gmra.mxu3 %v138_v45 }
 0x134   :  { %248 = vmatmul.f32.gmra.mxu1 %v117_v46  ;;  %272 = vmatmul.f32.gmra.mxu3 %v141_v47 }
 0x179   :  { %v228_v48 = vpop.f32.mrf.mxu1 }
 0x17a   :  { %276 = vst [vmem:[%s544_s2 + $0x8] sm:$0xff] %v228_v48 }
 0x17f   :  { %v252_v49 = vpop.f32.mrf.mxu3 }
 0x180   :  { %284 = vst [vmem:[%s544_s2 + $0x88] sm:$0xff] %v252_v49 }
 0x181   :  { %v231_v50 = vpop.f32.mrf.mxu1 }
 0x182   :  { %277 = vst [vmem:[%s544_s2 + $0x18] sm:$0xff] %v231_v50 }
 0x187   :  { %v255_v51 = vpop.f32.mrf.mxu3 }
 0x188   :  { %285 = vst [vmem:[%s544_s2 + $0x98] sm:$0xff] %v255_v51 }
 0x189   :  { %v234_v52 = vpop.f32.mrf.mxu1 }
 0x18a   :  { %278 = vst [vmem:[%s544_s2 + $0x28] sm:$0xff] %v234_v52 }
 0x18f   :  { %v258_v53 = vpop.f32.mrf.mxu3 }
 0x190   :  { %286 = vst [vmem:[%s544_s2 + $0xa8] sm:$0xff] %v258_v53 }
 0x191   :  { %v237_v54 = vpop.f32.mrf.mxu1 }
 0x192   :  { %279 = vst [vmem:[%s544_s2 + $0x38] sm:$0xff] %v237_v54 }
 0x197   :  { %v261_v55 = vpop.f32.mrf.mxu3 }
 0x198   :  { %287 = vst [vmem:[%s544_s2 + $0xb8] sm:$0xff] %v261_v55 }
 0x199   :  { %v240_v56 = vpop.f32.mrf.mxu1 }
 0x19a   :  { %280 = vst [vmem:[%s544_s2 + $0x48] sm:$0xff] %v240_v56 }
 0x19f   :  { %v264_v57 = vpop.f32.mrf.mxu3 }
 0x1a0   :  { %288 = vst [vmem:[%s544_s2 + $0xc8] sm:$0xff] %v264_v57 }
 0x1a1   :  { %v243_v58 = vpop.f32.mrf.mxu1 }
 0x1a2   :  { %281 = vst [vmem:[%s544_s2 + $0x58] sm:$0xff] %v243_v58 }
 0x1a7   :  { %v267_v59 = vpop.f32.mrf.mxu3 }
 0x1a8   :  { %289 = vst [vmem:[%s544_s2 + $0xd8] sm:$0xff] %v267_v59 }
 0x1a9   :  { %v246_v60 = vpop.f32.mrf.mxu1 }
 0x1aa   :  { %282 = vst [vmem:[%s544_s2 + $0x68] sm:$0xff] %v246_v60 }
 0x1af   :  { %v270_v61 = vpop.f32.mrf.mxu3 }
 0x1b0   :  { %290 = vst [vmem:[%s544_s2 + $0xe8] sm:$0xff] %v270_v61 }
 0x1b1   :  { %v249_v62 = vpop.f32.mrf.mxu1 }
 0x1b2   :  { %283 = vst [vmem:[%s544_s2 + $0x78] sm:$0xff] %v249_v62 }
 0x1b7   :  { %v273_v63 = vpop.f32.mrf.mxu3 }
 0x1b8   :  { %291 = vst [vmem:[%s544_s2 + $0xf8] sm:$0xff] %v273_v63 }

</bundles_post_ra>
